<compile_context>
chip_gen: v7x
topology: tpu7x:2x2x1
jax: 0.10.0
libtpu: 0.0.40
codegen_flags: <defaults>
</compile_context>

<pallas_src>
import math
from functools import partial

import jax
import jax.numpy as jnp
from jax.experimental import pallas as pl
from jax.experimental.pallas import tpu as pltpu


LAMBDA = 0.6  # self.Lambda in the PyTorch module


def get_important_channel_num(C, lam=LAMBDA):
    t = lam * C
    floor = math.floor(t)
    return floor + floor % 2


def _choose_hw_tile(C, HW, target_bytes=2 << 20):
    """Lane tile over the flattened spatial axis: ~2 MB x-block, multiple of 128."""
    if HW * C * 4 <= target_bytes or HW <= 512:
        return int(HW)
    t = (target_bytes // (4 * C)) // 128 * 128
    return int(max(128, min(t, HW)))


def _choose_batch_tile(B, C, t_hw, target_bytes=2 << 20):
    """Pack several batch rows per grid step when blocks are tiny (amortize step overhead)."""
    per_b = 4 * C * t_hw
    return int(max(1, min(B, target_bytes // max(per_b, 1))))


def _vmem_limit(block_bytes):
    # 2x for double buffering + slack, capped well below v7x's 64 MiB physical VMEM.
    return int(min(max(2 * block_bytes + (8 << 20), 16 << 20), 48 << 20))


# --------------------------------------------------------------------------- #
# Kernel 1: masked channel pooling                                             #
# --------------------------------------------------------------------------- #
def _pool_kernel(x_ref, im_ref, o_ref, *, inv_cim, inv_csub):
    # x_ref : VMEM (TB, C, T)   flattened-spatial activation block
    # im_ref: VMEM (TB, C, 1)   0/1 mask of important channels
    # o_ref : VMEM (TB, 4, T)   [im_avg, im_max, subim_avg, subim_max]
    x = x_ref[...]
    im = im_ref[...]
    sub = 1.0 - im
    xi = x * im                     # important_features
    xs = x * sub                    # subimportant_features
    # torch: mean over *all* C then * (C/C_im)  ==  sum over important / C_im
    o_ref[:, 0:1, :] = jnp.sum(xi, axis=1, keepdims=True) * inv_cim
    # torch: max over all C of masked features (zeros from masked channels included)
    o_ref[:, 1:2, :] = jnp.max(xi, axis=1, keepdims=True)
    o_ref[:, 2:3, :] = jnp.sum(xs, axis=1, keepdims=True) * inv_csub
    o_ref[:, 3:4, :] = jnp.max(xs, axis=1, keepdims=True)


# --------------------------------------------------------------------------- #
# Kernel 2: 7x7 conv (2->1) + BatchNorm(eval) + ReLU + Sigmoid                 #
# --------------------------------------------------------------------------- #
def _conv_bn_act_kernel(w_ref, bn_ref, p_ref, a_ref, *, H, W, K):
    # w_ref : SMEM (2*K*K,)  conv weights, channel-major [ch0(KxK), ch1(KxK)]
    # bn_ref: SMEM (2,)      [scale, shift] of eval-mode BatchNorm2d(1)
    # p_ref : VMEM (1, 4, H+K-1, W+K-1)  host-zero-padded pooled maps
    # a_ref : VMEM (1, 2, H, W)          A_S1 / A_S2 (post sigmoid)
    p = p_ref[...]
    acc1 = jnp.zeros((1, 1, H, W), jnp.float32)
    acc2 = jnp.zeros((1, 1, H, W), jnp.float32)
    for dy in range(K):
        for dx in range(K):
            w0 = w_ref[dy * K + dx]            # tap for the avg-pool channel
            w1 = w_ref[K * K + dy * K + dx]    # tap for the max-pool channel
            win = p[:, :, dy:dy + H, dx:dx + W]            # (1, 4, H, W)
            acc1 = acc1 + w0 * win[:, 0:1] + w1 * win[:, 1:2]
            acc2 = acc2 + w0 * win[:, 2:3] + w1 * win[:, 3:4]
    scale = bn_ref[0]
    shift = bn_ref[1]
    a_ref[:, 0:1, :, :] = jax.nn.sigmoid(jnp.maximum(acc1 * scale + shift, 0.0))
    a_ref[:, 1:2, :, :] = jax.nn.sigmoid(jnp.maximum(acc2 * scale + shift, 0.0))


# --------------------------------------------------------------------------- #
# Kernel 3: apply attention maps back to the features                          #
# --------------------------------------------------------------------------- #
def _apply_kernel(x_ref, im_ref, a_ref, o_ref):
    # x_ref : VMEM (TB, C, T)
    # im_ref: VMEM (TB, C, 1)
    # a_ref : VMEM (TB, 2, T)   [A_S1, A_S2]
    # o_ref : VMEM (TB, C, T)
    x = x_ref[...]
    im = im_ref[...]
    gate = im * a_ref[:, 0:1, :] + (1.0 - im) * a_ref[:, 1:2, :]   # (TB, C, T)
    o_ref[...] = x * gate          # == im*x*A_S1 + (1-im)*x*A_S2 exactly (mask is 0/1)


# --------------------------------------------------------------------------- #
# Wrapper                                                                      #
# --------------------------------------------------------------------------- #
def spatial_attention(x, M, conv_w, bn_gamma, bn_beta, bn_mean, bn_var,
                      *, eps=1e-5, lam=LAMBDA):
    """Forward of SpatialAttention.

    x:      (B, C, H, W) float32 features
    M:      (B, C, 1, 1) float32 channel-attention map
    conv_w: (1, 2, K, K) float32, nn.Conv2d(2, 1, K, padding=K//2, bias=False)
    bn_*:   BatchNorm2d(1) params / running stats, applied in eval mode.
    Returns (B, C, H, W) float32 refined features.
    """
    B, C, H, W = x.shape
    HW = H * W
    K = conv_w.shape[-1]
    pad = K // 2
    C_im = get_important_channel_num(C, lam)
    C_sub = C - C_im
    assert 0 < C_im < C, "need at least one important and one sub-important channel"

    x_flat = x.reshape(B, C, HW).astype(jnp.float32)

    # TODO(synk): the data-dependent torch.topk + scatter channel-mask stays in plain
    # JAX glue (tiny (B, C) tensor); everything bandwidth-relevant runs in Pallas.
    m = M.reshape(B, C).astype(jnp.float32)
    _, topk_idx = jax.lax.top_k(m, C_im)
    im_mask = jnp.zeros((B, C), jnp.float32)
    im_mask = im_mask.at[jnp.arange(B)[:, None], topk_idx].set(1.0)
    im_mask = im_mask[:, :, None]                                   # (B, C, 1)

    # Eval-mode BatchNorm folded into scale/shift (running stats).
    bn_scale = bn_gamma / jnp.sqrt(bn_var + eps)
    bn_shift = bn_beta - bn_mean * bn_scale
    bn_params = jnp.stack([bn_scale, bn_shift]).astype(jnp.float32)  # (2,)
    w_flat = conv_w.reshape(-1).astype(jnp.float32)                  # (2*K*K,)

    t_hw = _choose_hw_tile(C, HW)
    tb = _choose_batch_tile(B, C, t_hw)
    nb = pl.cdiv(B, tb)
    nh = pl.cdiv(HW, t_hw)

    # ---------------- kernel 1: masked channel pooling -> (B, 4, HW)
    pool_block_bytes = tb * C * t_hw * 4 + tb * (C + 4 * t_hw) * 4
    pooled = pl.pallas_call(
        partial(_pool_kernel, inv_cim=1.0 / C_im, inv_csub=1.0 / C_sub),
        out_shape=jax.ShapeDtypeStruct((B, 4, HW), jnp.float32),
        grid=(nb, nh),
        in_specs=[
            pl.BlockSpec((tb, C, t_hw), lambda b, h: (b, 0, h)),
            pl.BlockSpec((tb, C, 1), lambda b, h: (b, 0, 0)),
        ],
        out_specs=pl.BlockSpec((tb, 4, t_hw), lambda b, h: (b, 0, h)),
        compiler_params=pltpu.CompilerParams(
            dimension_semantics=("parallel", "parallel"),
            vmem_limit_bytes=_vmem_limit(pool_block_bytes)),
    )(x_flat, im_mask)

    # ---------------- kernel 2: conv(7x7, 2->1) + BN(eval) + ReLU + sigmoid
    # Zero-pad the tiny pooled maps on the host so the kernel is pure shifted FMAs.
    pooled_pad = jnp.pad(pooled.reshape(B, 4, H, W),
                         ((0, 0), (0, 0), (pad, pad), (pad, pad)))
    attn = pl.pallas_call(
        partial(_conv_bn_act_kernel, H=H, W=W, K=K),
        out_shape=jax.ShapeDtypeStruct((B, 2, H, W), jnp.float32),
        grid=(B,),
        in_specs=[
            pl.BlockSpec(memory_space=pltpu.MemorySpace.SMEM),   # conv weights
            pl.BlockSpec(memory_space=pltpu.MemorySpace.SMEM),   # bn scale/shift
            pl.BlockSpec((1, 4, H + 2 * pad, W + 2 * pad), lambda b: (b, 0, 0, 0)),
        ],
        out_specs=pl.BlockSpec((1, 2, H, W), lambda b: (b, 0, 0, 0)),
        compiler_params=pltpu.CompilerParams(
            dimension_semantics=("parallel",)),
    )(w_flat, bn_params, pooled_pad)

    # ---------------- kernel 3: refined = x * (im*A_S1 + (1-im)*A_S2) -> (B, C, HW)
    attn_flat = attn.reshape(B, 2, HW)
    apply_block_bytes = 2 * tb * C * t_hw * 4 + tb * (C + 2 * t_hw) * 4
    refined = pl.pallas_call(
        _apply_kernel,
        out_shape=jax.ShapeDtypeStruct((B, C, HW), jnp.float32),
        grid=(nb, nh),
        in_specs=[
            pl.BlockSpec((tb, C, t_hw), lambda b, h: (b, 0, h)),
            pl.BlockSpec((tb, C, 1), lambda b, h: (b, 0, 0)),
            pl.BlockSpec((tb, 2, t_hw), lambda b, h: (b, 0, h)),
        ],
        out_specs=pl.BlockSpec((tb, C, t_hw), lambda b, h: (b, 0, h)),
        compiler_params=pltpu.CompilerParams(
            dimension_semantics=("parallel", "parallel"),
            vmem_limit_bytes=_vmem_limit(apply_block_bytes)),
    )(x_flat, im_mask, attn_flat)

    return refined.reshape(B, C, H, W)


# --------------------------------------------------------------------------- #
# Plain-JAX reference mirroring the PyTorch forward (eval-mode BatchNorm)      #
# --------------------------------------------------------------------------- #
def spatial_attention_ref(x, M, conv_w, bn_gamma, bn_beta, bn_mean, bn_var,
                          *, eps=1e-5, lam=LAMBDA):
    B, C, H, W = x.shape
    C_im = get_important_channel_num(C, lam)
    C_sub = C - C_im
    pad = conv_w.shape[-1] // 2

    m = M.reshape(B, C)
    _, topk_idx = jax.lax.top_k(m, C_im)
    im = jnp.zeros((B, C), jnp.float32).at[jnp.arange(B)[:, None], topk_idx].set(1.0)
    sub = 1.0 - im
    imf = im[:, :, None, None] * x
    subf = sub[:, :, None, None] * x

    im_avg = jnp.mean(imf, axis=1, keepdims=True) * (C / C_im)
    im_max = jnp.max(imf, axis=1, keepdims=True)
    sub_avg = jnp.mean(subf, axis=1, keepdims=True) * (C / C_sub)
    sub_max = jnp.max(subf, axis=1, keepdims=True)
    im_x = jnp.concatenate([im_avg, im_max], axis=1)
    sub_x = jnp.concatenate([sub_avg, sub_max], axis=1)

    def conv(a):
        return jax.lax.conv_general_dilated(
            a, conv_w, window_strides=(1, 1),
            padding=((pad, pad), (pad, pad)),
            dimension_numbers=("NCHW", "OIHW", "NCHW"),
            precision=jax.lax.Precision.HIGHEST)

    bn_scale = bn_gamma / jnp.sqrt(bn_var + eps)
    bn_shift = bn_beta - bn_mean * bn_scale

    def act(z):
        return jax.nn.sigmoid(jnp.maximum(z * bn_scale + bn_shift, 0.0))

    A_S1 = act(conv(im_x))
    A_S2 = act(conv(sub_x))
    return imf * A_S1 + subf * A_S2


if __name__ == "__main__":
    B, C, H, W = 2, 16, 16, 16
    K = 7

    key = jax.random.PRNGKey(0)
    kx, km, kw = jax.random.split(key, 3)

    x = jax.random.normal(kx, (B, C, H, W), dtype=jnp.float32)
    M = jax.random.normal(km, (B, C, 1, 1), dtype=jnp.float32)     # channel-attention map
    conv_w = jax.random.normal(kw, (1, 2, K, K), dtype=jnp.float32) * 0.2

    # Eval-mode BatchNorm2d(1) parameters / running stats (non-trivial values).
    bn_gamma = jnp.float32(1.2)
    bn_beta = jnp.float32(-0.1)
    bn_mean = jnp.float32(0.05)
    bn_var = jnp.float32(0.8)

    out = spatial_attention(x, M, conv_w, bn_gamma, bn_beta, bn_mean, bn_var)
    out = jax.block_until_ready(out)

    ref = spatial_attention_ref(x, M, conv_w, bn_gamma, bn_beta, bn_mean, bn_var)
    assert out.shape == (B, C, H, W)
    assert jnp.allclose(out, ref, atol=1e-4, rtol=1e-4), "mismatch vs reference"

    print("KERNEL_OK")
</pallas_src>

<mosaic_0001>
module attributes {stable_mosaic.version = 11 : i64} {
  func.func @_pool_kernel(%arg0: i32, %arg1: i32, %arg2: memref<2x16x256xf32, #tpu.memory_space<vmem>>, %arg3: memref<2x16x1xf32, #tpu.memory_space<vmem>>, %arg4: memref<2x4x256xf32, #tpu.memory_space<vmem>>) attributes {dimension_semantics = [#tpu.dimension_semantics<parallel>, #tpu.dimension_semantics<parallel>], iteration_bounds = array<i64: 1, 1>, scalar_prefetch = 0 : i64, scratch_operands = 0 : i64, tpu.core_type = #tpu.core_type<tc>, window_params = [{transform_indices = @transform_0, window_bounds = array<i64: 2, 16, 256>}, {transform_indices = @transform_1, window_bounds = array<i64: 2, 16, 1>}, {transform_indices = @transform_2, window_bounds = array<i64: 2, 4, 256>}]} {
    %c0 = arith.constant 0 : index
    %c0_0 = arith.constant 0 : index
    %c0_1 = arith.constant 0 : index
    %0 = vector.load %arg2[%c0, %c0_0, %c0_1] : memref<2x16x256xf32, #tpu.memory_space<vmem>>, vector<2x16x256xf32>
    %c0_2 = arith.constant 0 : index
    %c0_3 = arith.constant 0 : index
    %c0_4 = arith.constant 0 : index
    %1 = vector.load %arg3[%c0_2, %c0_3, %c0_4] : memref<2x16x1xf32, #tpu.memory_space<vmem>>, vector<2x16x1xf32>
    %cst = arith.constant 1.000000e+00 : f32
    %2 = vector.broadcast %cst : f32 to vector<2x16x1xf32>
    %3 = arith.subf %2, %1 : vector<2x16x1xf32>
    %4 = vector.broadcast %1 : vector<2x16x1xf32> to vector<2x16x256xf32>
    %5 = arith.mulf %0, %4 : vector<2x16x256xf32>
    %6 = vector.broadcast %3 : vector<2x16x1xf32> to vector<2x16x256xf32>
    %7 = arith.mulf %0, %6 : vector<2x16x256xf32>
    %cst_5 = arith.constant dense<0.000000e+00> : vector<2x256xf32>
    %8 = vector.multi_reduction <add>, %5, %cst_5 [1] : vector<2x16x256xf32> to vector<2x256xf32>
    %9 = vector.shape_cast %8 : vector<2x256xf32> to vector<2x1x256xf32>
    %cst_6 = arith.constant 1.000000e-01 : f32
    %10 = vector.broadcast %cst_6 : f32 to vector<2x1x256xf32>
    %11 = arith.mulf %9, %10 : vector<2x1x256xf32>
    %c0_7 = arith.constant 0 : index
    %c0_8 = arith.constant 0 : index
    %c0_9 = arith.constant 0 : index
    %12 = vector.load %arg4[%c0_7, %c0_8, %c0_9] : memref<2x4x256xf32, #tpu.memory_space<vmem>>, vector<2x1x256xf32>
    tpu.vector_store %arg4[%c0_7, %c0_8, %c0_9], %11 {strides = array<i32>} : memref<2x4x256xf32, #tpu.memory_space<vmem>>, vector<2x1x256xf32>,
    %cst_10 = arith.constant dense<0xFF800000> : vector<2x256xf32>
    %13 = vector.multi_reduction <maximumf>, %5, %cst_10 [1] : vector<2x16x256xf32> to vector<2x256xf32>
    %14 = vector.shape_cast %13 : vector<2x256xf32> to vector<2x1x256xf32>
    %c0_11 = arith.constant 0 : index
    %c1 = arith.constant 1 : index
    %c0_12 = arith.constant 0 : index
    %15 = vector.load %arg4[%c0_11, %c1, %c0_12] : memref<2x4x256xf32, #tpu.memory_space<vmem>>, vector<2x1x256xf32>
    tpu.vector_store %arg4[%c0_11, %c1, %c0_12], %14 {strides = array<i32>} : memref<2x4x256xf32, #tpu.memory_space<vmem>>, vector<2x1x256xf32>,
    %cst_13 = arith.constant dense<0.000000e+00> : vector<2x256xf32>
    %16 = vector.multi_reduction <add>, %7, %cst_13 [1] : vector<2x16x256xf32> to vector<2x256xf32>
    %17 = vector.shape_cast %16 : vector<2x256xf32> to vector<2x1x256xf32>
    %cst_14 = arith.constant 0.166666672 : f32
    %18 = vector.broadcast %cst_14 : f32 to vector<2x1x256xf32>
    %19 = arith.mulf %17, %18 : vector<2x1x256xf32>
    %c0_15 = arith.constant 0 : index
    %c2 = arith.constant 2 : index
    %c0_16 = arith.constant 0 : index
    %20 = vector.load %arg4[%c0_15, %c2, %c0_16] : memref<2x4x256xf32, #tpu.memory_space<vmem>>, vector<2x1x256xf32>
    tpu.vector_store %arg4[%c0_15, %c2, %c0_16], %19 {strides = array<i32>} : memref<2x4x256xf32, #tpu.memory_space<vmem>>, vector<2x1x256xf32>,
    %cst_17 = arith.constant dense<0xFF800000> : vector<2x256xf32>
    %21 = vector.multi_reduction <maximumf>, %7, %cst_17 [1] : vector<2x16x256xf32> to vector<2x256xf32>
    %22 = vector.shape_cast %21 : vector<2x256xf32> to vector<2x1x256xf32>
    %c0_18 = arith.constant 0 : index
    %c3 = arith.constant 3 : index
    %c0_19 = arith.constant 0 : index
    %23 = vector.load %arg4[%c0_18, %c3, %c0_19] : memref<2x4x256xf32, #tpu.memory_space<vmem>>, vector<2x1x256xf32>
    tpu.vector_store %arg4[%c0_18, %c3, %c0_19], %22 {strides = array<i32>} : memref<2x4x256xf32, #tpu.memory_space<vmem>>, vector<2x1x256xf32>,
    return
  }
  func.func @transform_0(%arg0: i32, %arg1: i32) -> (i32, i32, i32) {
    %c0_i32 = arith.constant 0 : i32
    %c0_i32_0 = arith.constant 0 : i32
    return %arg0, %c0_i32, %arg1 : i32, i32, i32
  }
  func.func @transform_1(%arg0: i32, %arg1: i32) -> (i32, i32, i32) {
    %c0_i32 = arith.constant 0 : i32
    %c0_i32_0 = arith.constant 0 : i32
    %c0_i32_1 = arith.constant 0 : i32
    return %arg0, %c0_i32, %c0_i32_0 : i32, i32, i32
  }
  func.func @transform_2(%arg0: i32, %arg1: i32) -> (i32, i32, i32) {
    %c0_i32 = arith.constant 0 : i32
    %c0_i32_0 = arith.constant 0 : i32
    return %arg0, %c0_i32, %arg1 : i32, i32, i32
  }
}

</mosaic_0001>

<bundles_post_ra>
// kernel: tpu_custom_call.1
= control target key start
LH: loop header
LB: loop body
LE: loop exit
PB: predicated region body
PF: predicated region fallthrough
CT: control target
= control target key end

     0   :  { %7 = vsyncpa [#allocation3], 0  ;;  %s585_s0 = inlined_call_operand.hbm [shape: f32[2,16,256], index: 0, kind: input, shape index: {}]   ;;  %s586_s1 = inlined_call_operand.vmem [shape: f32[2,16,1], index: 1, kind: input, shape index: {}]   ;;  %s587_s2 = inlined_call_operand.hbm [shape: f32[2,4,256], index: 2, kind: output, shape index: {}]  }
   0x1   :  { %8 = vsyncpa [#allocation4], 0  ;;  %s456_s9 = smov [#allocation2]   ;;  %s408_s13 = scalar_lea.hbm %s585_s0, 1024 }
   0x2   :  { %s14_s10 = sshll.u32 %s456_s9, 4  ;;  %p409_p0 = scmp.ne.s32.totalorder %s585_s0, %s408_s13  ;;  %s15_s10 = int_to_ptr.vmem [resolvable:$true] %s14_s10 }
   0x3   :  { %p412_p1 = scmp.lt.u32.totalorder %s408_s13, %s585_s0 }
   0x5   :  { %p414_p2 = pnand %p412_p1, %p409_p0 }
   0x7   :  { %417 = shalt.err (!%p414_p2)
}
   0x8   :  { %s418_s18 = scalar_lea.vmem %s15_s10, 1024  ;;  %p423_p4 = scmp.lt.s32.totalorder %s15_s10, %s15_s10 }
   0x9   :  { %p419_p3 = scmp.ne.s32.totalorder %s15_s10, %s418_s18  ;;  %p424_p5 = scmp.lt.s32.totalorder %s418_s18, %s418_s18 }
   0xb   :  { %p425_p6 = por %p424_p5, %p423_p4 }
   0xd   :  { %p426_p7 = pnand %p425_p6, %p419_p3 }
   0xf   :  { %429 = shalt.err (!%p426_p7)
}
  0x10   :  { %s457_s19 = smov 256   ;;  %s458_s20 = smov 16  }
  0x11   :  { %20 = dma.hbm_to_vmem [thread:$0]  %s585_s0, 1024, %s15_s10, [#allocation3], %s457_s19, %s457_s19, %s458_s20  }
  0x12   :  { %452 = dma.done.wait [#allocation3], 1024  }
  0x13   :  { %453 = vsyncadd [#allocation3], 4294966272  ;;  %v459_v0 = vmov 0   ;;  %v36_v1 = vld [vmem:[%s586_s1 + $0x10] sm:$0xff]  ;;  %v34_v2 = vld [vmem:[%s586_s1] sm:$0xff]  ;;  %v138_v11 = vlaneseq }
  0x14   :  { %407 = vset.pattern.permute.xlu1 %v459_v0  ;;  %406 = vset.pattern.permute.xlu0 %v459_v0  ;;  %v37_v3 = vld [vmem:[%s586_s1 + $0x18] sm:$0xff]  ;;  %v35_v4 = vld [vmem:[%s586_s1 + $0x8] sm:$0xff]  ;;  %v38_v5 = vsub.f32 1.0, %v34_v2  ;;  %v40_v7 = vsub.f32 1.0, %v36_v1  ;;  %v460_v9 = vmov 1966171168  }
  0x15   :  { %54 = vperm.xlu1 %407, %v36_v1   ;;  %44 = vperm.xlu0 %406, %v34_v2   ;;  %v39_v6 = vsub.f32 1.0, %v35_v4  ;;  %v41_v8 = vsub.f32 1.0, %v37_v3  ;;  %v136_v10 = vunpack.c.l.s4 %v460_v9  ;;  %v26_v14 = vld [vmem:[#allocation2] sm:$0xff]  ;;  %v27_v15 = vld [vmem:[#allocation2 + $0x8] sm:$0xff]  ;;  %v28_v16 = vld [vmem:[#allocation2 + $0x10] sm:$0xff]  ;;  %v139_v18 = vshrl.u32 %v138_v11, 7 }
  0x16   :  { %v29_v19 = vld [vmem:[#allocation2 + $0x18] sm:$0xff]  ;;  %v503_v20 = vld [vmem:[#allocation2 + $0x30] sm:$0xff]  ;;  %v507_v22 = vld [vmem:[#allocation2 + $0x20] sm:$0xff]  ;;  %vm525_vm0 = vcmp.lt.s32.totalorder %v138_v11, 256  ;;  %s461_s1 = smov [#allocation5]  }
  0x17   :  { %v137_v17 = vunpack.c.0.s8 %v136_v10  ;;  %v505_v21 = vld [vmem:[#allocation2 + $0x38] sm:$0xff]  ;;  %v509_v23 = vld [vmem:[#allocation2 + $0x28] sm:$0xff]  ;;  %s386_s30 = sshll.u32 %s461_s1, 4  ;;  %s387_s30 = int_to_ptr.vmem [resolvable:$true] %s386_s30 }
  0x18   :  { %s430_s3 = scalar_lea.vmem %s387_s30, 256  ;;  %p435_p9 = scmp.lt.s32.totalorder %s387_s30, %s387_s30 }
  0x19   :  { %59 = vperm.xlu1 %407, %v37_v3   ;;  %49 = vperm.xlu0 %406, %v35_v4   ;;  %v513_v32 = vsub.s32 %v137_v17, %v139_v18  ;;  %p431_p8 = scmp.ne.s32.totalorder %s387_s30, %s430_s3  ;;  %p436_p10 = scmp.lt.s32.totalorder %s430_s3, %s430_s3 }
  0x1b   :  { %p437_p11 = por %p436_p10, %p435_p9 }
  0x1d   :  { %77 = vperm.xlu1 %407, %v39_v6   ;;  %72 = vperm.xlu0 %406, %v38_v5   ;;  %p438_p12 = pnand %p437_p11, %p431_p8 }
  0x21   :  { %87 = vperm.xlu1 %407, %v41_v8   ;;  %82 = vperm.xlu0 %406, %v40_v7  }
  0x94   :  { %v55_v12 = vpop.permute.xlu1 %54  ;;  %v45_v13 = vpop.permute.xlu0 %44 }
  0x95   :  { %v62_v24 = vmul.f32 %v45_v13, %v26_v14  ;;  %v63_v25 = vmul.f32 %v45_v13, %v27_v15  ;;  %v66_v33 = vmul.f32 %v55_v12, %v507_v22  ;;  %v67_v34 = vmul.f32 %v55_v12, %v509_v23 }
  0x98   :  { %v60_v26 = vpop.permute.xlu1 %59  ;;  %v50_v27 = vpop.permute.xlu0 %49 }
  0x99   :  { %v64_v28 = vmul.f32 %v50_v27, %v28_v16  ;;  %v65_v29 = vmul.f32 %v50_v27, %v29_v19  ;;  %v68_v30 = vmul.f32 %v60_v26, %v503_v20  ;;  %v69_v31 = vmul.f32 %v60_v26, %v505_v21 }
  0x9b   :  { %v98_v35 = vadd.f32 %v64_v28, %v62_v24  ;;  %v105_v36 = vadd.f32 %v65_v29, %v63_v25  ;;  %v173_v37 = vmax.f32 %v62_v24, %v64_v28  ;;  %v180_v38 = vmax.f32 %v63_v25, %v65_v29 }
  0x9c   :  { %v78_v39 = vpop.permute.xlu1 %77  ;;  %v73_v40 = vpop.permute.xlu0 %72  ;;  %v517_v41 = vadd.f32 %v68_v30, %v66_v33  ;;  %v519_v42 = vadd.f32 %v69_v31, %v67_v34  ;;  %v521_v43 = vmax.f32 %v66_v33, %v68_v30  ;;  %v523_v44 = vmax.f32 %v67_v34, %v69_v31 }
  0x9d   :  { %v99_v45 = vrot.slane %v98_v35, 4  ;;  %v106_v46 = vrot.slane %v105_v36, 4  ;;  %v174_v47 = vrot.slane %v173_v37, 4  ;;  %v181_v48 = vrot.slane %v180_v38, 4 }
  0x9e   :  { %v92_v49 = vmul.f32 %v78_v39, %v28_v16  ;;  %v93_v50 = vmul.f32 %v78_v39, %v29_v19  ;;  %v90_v51 = vmul.f32 %v73_v40, %v26_v14  ;;  %v91_v52 = vmul.f32 %v73_v40, %v27_v15 }
  0x9f   :  { %v100_v53 = vadd.f32 %v99_v45, %v98_v35  ;;  %v107_v54 = vadd.f32 %v106_v46, %v105_v36  ;;  %v175_v55 = vmax.f32 %v173_v37, %v174_v47  ;;  %v182_v56 = vmax.f32 %v180_v38, %v181_v48 }
  0xa0   :  { %v241_v57 = vadd.f32 %v92_v49, %v90_v51  ;;  %v248_v58 = vadd.f32 %v93_v50, %v91_v52  ;;  %v313_v59 = vmax.f32 %v90_v51, %v92_v49  ;;  %v320_v60 = vmax.f32 %v91_v52, %v93_v50  ;;  %v88_v27 = vpop.permute.xlu1 %87  ;;  %v83_v36 = vpop.permute.xlu0 %82 }
  0xa1   :  { %v101_v61 = vrot.slane %v100_v53, 2  ;;  %v108_v62 = vrot.slane %v107_v54, 2  ;;  %v176_v63 = vrot.slane %v175_v55, 2  ;;  %v183_v0 = vrot.slane %v182_v56, 2 }
  0xa2   :  { %v242_v1 = vrot.slane %v241_v57, 4  ;;  %v249_v2 = vrot.slane %v248_v58, 4  ;;  %v314_v3 = vrot.slane %v313_v59, 4  ;;  %v321_v4 = vrot.slane %v320_v60, 4 }
  0xa3   :  { %v102_v5 = vadd.f32 %v101_v61, %v100_v53  ;;  %v109_v6 = vadd.f32 %v108_v62, %v107_v54  ;;  %v177_v7 = vmax.f32 %v175_v55, %v176_v63  ;;  %v184_v8 = vmax.f32 %v182_v56, %v183_v0 }
  0xa4   :  { %v243_v10 = vadd.f32 %v242_v1, %v241_v57  ;;  %v250_v12 = vadd.f32 %v249_v2, %v248_v58  ;;  %v315_v13 = vmax.f32 %v313_v59, %v314_v3  ;;  %v322_v14 = vmax.f32 %v320_v60, %v321_v4 }
  0xa5   :  { %v103_v15 = vrot.slane %v102_v5, 1  ;;  %v110_v16 = vrot.slane %v109_v6, 1  ;;  %v178_v17 = vrot.slane %v177_v7, 1  ;;  %v185_v18 = vrot.slane %v184_v8, 1 }
  0xa6   :  { %v244_v19 = vrot.slane %v243_v10, 2  ;;  %v251_v24 = vrot.slane %v250_v12, 2  ;;  %v316_v25 = vrot.slane %v315_v13, 2  ;;  %v323_v26 = vrot.slane %v322_v14, 2 }
  0xa7   :  { %v104_v28 = vadd.f32 %v103_v15, %v102_v5  ;;  %v111_v29 = vadd.f32 %v110_v16, %v109_v6  ;;  %v179_v30 = vmax.f32 %v177_v7, %v178_v17  ;;  %v186_v11 = vmax.f32 %v184_v8, %v185_v18 }
  0xa8   :  { %v245_v31 = vadd.f32 %v244_v19, %v243_v10  ;;  %v252_v33 = vadd.f32 %v251_v24, %v250_v12  ;;  %v317_v34 = vmax.f32 %v315_v13, %v316_v25  ;;  %v324_v35 = vmax.f32 %v322_v14, %v323_v26 }
  0xa9   :  { %v126_v37 = vmul.f32 0.1, %v104_v28  ;;  %v127_v38 = vmul.f32 0.1, %v111_v29  ;;  %v205_v39 = vcombine.low %v179_v30, %v186_v11  ;;  %v96_v40 = vmul.f32 %v88_v27, %v503_v20 }
  0xaa   :  { %v246_v45 = vrot.slane %v245_v31, 1  ;;  %v253_v46 = vrot.slane %v252_v33, 1  ;;  %v318_v47 = vrot.slane %v317_v34, 1  ;;  %v325_v48 = vrot.slane %v324_v35, 1 }
  0xab   :  { %v134_v49 = vcombine.low %v126_v37, %v127_v38  ;;  %v212_v50 = vrot.slane %v205_v39, %v513_v32  ;;  %v97_v51 = vmul.f32 %v88_v27, %v505_v21  ;;  %v94_v52 = vmul.f32 %v83_v36, %v507_v22 }
  0xac   :  { %v247_v53 = vadd.f32 %v246_v45, %v245_v31  ;;  %v254_v54 = vadd.f32 %v253_v46, %v252_v33  ;;  %v319_v55 = vmax.f32 %v317_v34, %v318_v47  ;;  %v326_v56 = vmax.f32 %v324_v35, %v325_v48 }
  0xad   :  { %v141_v57 = vrot.slane %v134_v49, %v513_v32  ;;  %v219_v58 = vrot.slane %v212_v50, %v513_v32  ;;  %v95_v20 = vmul.f32 %v83_v36, %v509_v23  ;;  %v113_v59 = vrot.slane %v517_v41, 4 }
  0xae   :  { %v269_v60 = vmul.f32 0.16666667, %v247_v53  ;;  %v270_v61 = vmul.f32 0.16666667, %v254_v54  ;;  %v345_v62 = vcombine.low %v319_v55, %v326_v56  ;;  %v120_v63 = vrot.slane %v519_v42, 4 }
  0xaf   :  { %v148_v21 = vrot.slane %v141_v57, %v513_v32  ;;  %238 = vst.msk [vmem:[#allocation5 + $0x1] ss:$4 sm:$0x3] %vm525_vm0, %v219_v58  ;;  %v114_v22 = vadd.f32 %v113_v59, %v517_v41  ;;  %v188_v0 = vrot.slane %v521_v43, 4  ;;  %v195_v1 = vrot.slane %v523_v44, 4 }
  0xb0   :  { %v277_v2 = vcombine.low %v269_v60, %v270_v61  ;;  %v352_v23 = vrot.slane %v345_v62, %v513_v32  ;;  %v121_v3 = vadd.f32 %v120_v63, %v519_v42  ;;  %v255_v4 = vadd.f32 %v96_v40, %v94_v52 }
  0xb1   :  { %170 = vst.msk [vmem:[#allocation5] ss:$4 sm:$0x3] %vm525_vm0, %v148_v21  ;;  %v115_v5 = vrot.slane %v114_v22, 2  ;;  %v189_v6 = vmax.f32 %v521_v43, %v188_v0  ;;  %v196_v7 = vmax.f32 %v523_v44, %v195_v1  ;;  %v262_v8 = vadd.f32 %v97_v51, %v95_v20 }
  0xb2   :  { %v284_v41 = vrot.slane %v277_v2, %v513_v32  ;;  %v359_v10 = vrot.slane %v352_v23, %v513_v32  ;;  %v122_v12 = vrot.slane %v121_v3, 2  ;;  %v256_v13 = vrot.slane %v255_v4, 4 }
  0xb3   :  { %v116_v14 = vadd.f32 %v115_v5, %v114_v22  ;;  %v190_v15 = vrot.slane %v189_v6, 2  ;;  %v197_v16 = vrot.slane %v196_v7, 2  ;;  %v263_v42 = vrot.slane %v262_v8, 4 }
  0xb4   :  { %v291_v17 = vrot.slane %v284_v41, %v513_v32  ;;  %378 = vst.msk [vmem:[#allocation5 + $0x3] ss:$4 sm:$0x3] %vm525_vm0, %v359_v10  ;;  %v123_v18 = vadd.f32 %v122_v12, %v121_v3  ;;  %v257_v43 = vadd.f32 %v256_v13, %v255_v4  ;;  %v327_v19 = vmax.f32 %v94_v52, %v96_v40 }
  0xb5   :  { %v117_v44 = vrot.slane %v116_v14, 1  ;;  %v191_v24 = vmax.f32 %v189_v6, %v190_v15  ;;  %v198_v25 = vmax.f32 %v196_v7, %v197_v16  ;;  %v264_v26 = vadd.f32 %v263_v42, %v262_v8 }
  0xb6   :  { %310 = vst.msk [vmem:[#allocation5 + $0x2] ss:$4 sm:$0x3] %vm525_vm0, %v291_v17  ;;  %v124_v27 = vrot.slane %v123_v18, 1  ;;  %v258_v28 = vrot.slane %v257_v43, 2  ;;  %v328_v29 = vrot.slane %v327_v19, 4  ;;  %v334_v30 = vmax.f32 %v95_v20, %v97_v51 }
  0xb7   :  { %v118_v11 = vadd.f32 %v117_v44, %v116_v14  ;;  %v192_v31 = vrot.slane %v191_v24, 1  ;;  %v199_v33 = vrot.slane %v198_v25, 1  ;;  %v265_v34 = vrot.slane %v264_v26, 2 }
  0xb8   :  { %v125_v35 = vadd.f32 %v124_v27, %v123_v18  ;;  %v259_v36 = vadd.f32 %v258_v28, %v257_v43  ;;  %v329_v37 = vmax.f32 %v327_v19, %v328_v29  ;;  %v335_v38 = vrot.slane %v334_v30, 4 }
  0xb9   :  { %v128_v39 = vmul.f32 0.1, %v118_v11  ;;  %v193_v40 = vmax.f32 %v191_v24, %v192_v31  ;;  %v200_v45 = vmax.f32 %v198_v25, %v199_v33  ;;  %v266_v46 = vadd.f32 %v265_v34, %v264_v26 }
  0xba   :  { %v129_v47 = vmul.f32 0.1, %v125_v35  ;;  %v260_v48 = vrot.slane %v259_v36, 1  ;;  %v330_v49 = vrot.slane %v329_v37, 2  ;;  %v336_v50 = vmax.f32 %v334_v30, %v335_v38 }
  0xbb   :  { %v220_v52 = vcombine.low %v193_v40, %v200_v45  ;;  %v267_v53 = vrot.slane %v266_v46, 1 }
  0xbc   :  { %v149_v54 = vcombine.low %v128_v39, %v129_v47  ;;  %v261_v51 = vadd.f32 %v260_v48, %v259_v36  ;;  %v331_v55 = vmax.f32 %v329_v37, %v330_v49  ;;  %v337_v56 = vrot.slane %v336_v50, 2 }
  0xbd   :  { %v227_v57 = vrot.slane %v220_v52, %v513_v32  ;;  %v268_v58 = vadd.f32 %v267_v53, %v266_v46 }
  0xbe   :  { %v156_v20 = vrot.slane %v149_v54, %v513_v32  ;;  %v271_v59 = vmul.f32 0.16666667, %v261_v51  ;;  %v332_v60 = vrot.slane %v331_v55, 1  ;;  %v338_v61 = vmax.f32 %v336_v50, %v337_v56 }
  0xbf   :  { %v234_v62 = vrot.slane %v227_v57, %v513_v32  ;;  %v272_v63 = vmul.f32 0.16666667, %v268_v58 }
  0xc0   :  { %v163_v21 = vrot.slane %v156_v20, %v513_v32  ;;  %v333_v22 = vmax.f32 %v331_v55, %v332_v60  ;;  %v339_v0 = vrot.slane %v338_v61, 1 }
  0xc1   :  { %240 = vst.msk [vmem:[#allocation5 + $0x9] ss:$4 sm:$0x3] %vm525_vm0, %v234_v62  ;;  %v292_v1 = vcombine.low %v271_v59, %v272_v63 }
  0xc2   :  { %172 = vst.msk [vmem:[#allocation5 + $0x8] ss:$4 sm:$0x3] %vm525_vm0, %v163_v21  ;;  %v340_v2 = vmax.f32 %v338_v61, %v339_v0 }
  0xc3   :  { %v299_v23 = vrot.slane %v292_v1, %v513_v32 }
  0xc4   :  { %v360_v3 = vcombine.low %v333_v22, %v340_v2 }
  0xc5   :  { %v306_v4 = vrot.slane %v299_v23, %v513_v32 }
  0xc6   :  { %v367_v5 = vrot.slane %v360_v3, %v513_v32 }
  0xc7   :  { %312 = vst.msk [vmem:[#allocation5 + $0xa] ss:$4 sm:$0x3] %vm525_vm0, %v306_v4 }
  0xc8   :  { %v374_v6 = vrot.slane %v367_v5, %v513_v32 }
  0xca   :  { %380 = vst.msk [vmem:[#allocation5 + $0xb] ss:$4 sm:$0x3] %vm525_vm0, %v374_v6 }
  0xcb   :  { %441 = shalt.err (!%p438_p12)
}
  0xcc   :  { %s442_s6 = scalar_lea.hbm %s587_s2, 256 }
  0xcd   :  { %p443_p13 = scmp.ne.s32.totalorder %s587_s2, %s442_s6  ;;  %p446_p0 = scmp.lt.u32.totalorder %s442_s6, %s587_s2 }
  0xcf   :  { %p448_p1 = pnand %p446_p0, %p443_p13 }
  0xd1   :  { %451 = shalt.err (!%p448_p1)
}
  0xd2   :  { %s462_s11 = smov 128   ;;  %s463_s12 = smov 8  }
  0xd3   :  { %392 = dma.vmem_to_hbm [thread:$0]  %s387_s30, 256, %s587_s2, [#allocation4], %s462_s11, %s462_s11, %s463_s12  }
  0xd4   :  { %454 = dma.done.wait [#allocation4], 256  }
  0xd5   :  { %455 = vsyncadd [#allocation4], 4294967040 }
  0xd6   :  { %396 = vsyncpa [#allocation3], 1 }
  0xd7   :  { %397 = vsyncpa [#allocation4], 1 }

</bundles_post_ra>
